<compile_context>
chip_gen: v7x
topology: tpu7x:2x2x1
jax: 0.10.0
libtpu: 0.0.40
codegen_flags: <defaults>
</compile_context>

<pallas_src>
import jax
import jax.numpy as jnp
from jax import lax
from jax.experimental import pallas as pl
from jax.experimental.pallas import tpu as pltpu

KH = KW = 3          # kernel_size = scale_factor + 1 = 3
STRIDE = 2
PAD = 1
OUT_PAD = 1


def _round_up(x, m):
    return (x + m - 1) // m * m


def _main_map(n, t):
    return (n, t, 0, 0)


def _make_halo_map(th):
    def halo_map(n, t):
        # block size along the row dim is 1 -> block index == element row.
        # Row (t+1)*th is the first row of the next tile (or the zero pad row
        # for the last tile, since the input is padded to H+1 rows).
        return (n, (t + 1) * th, 0, 0)
    return halo_map


def _make_kernel(n_inputs, w_out):
    """Sub-pixel ConvTranspose tile: one MXU dot per (batch, row-tile) step.

    refs = (*x_main, *x_halo, w_ref, b_ref, o_ref)
      x_main[i]: (1, TH, Wp, cin_i)  bf16   TH rows of the padded input
      x_halo[i]: (1, 1,  Wp, cin_i)  bf16   the 1-row bottom halo
      w_ref:     (4*cin_total, P)    bf16   taps (a*2+b)-major, then channels
      b_ref:     (1, P)              f32
      o_ref:     (1, TH, W, P)       bf16   P = 4*Cout (pre-shuffle phases)
    """

    def kernel(*refs):
        x_main = refs[:n_inputs]
        x_halo = refs[n_inputs:2 * n_inputs]
        w_ref = refs[2 * n_inputs]
        b_ref = refs[2 * n_inputs + 1]
        o_ref = refs[2 * n_inputs + 2]
        th = o_ref.shape[1]

        # TH main rows + 1 halo row -> (TH+1, Wp, cin_i) per input (row-axis
        # concat is a cheap buffer-adjacent copy, not a lane shuffle).
        fulls = [jnp.concatenate([x_main[i][0], x_halo[i][0]], axis=0)
                 for i in range(n_inputs)]

        # Stack all 4 tap-shifted views of all (concat-fused) inputs along the
        # channel (lane) axis -> single dot with K = 4*cin_total.  Ordering is
        # tap-major (a*2+b) then the concatenated-input channel order, which
        # matches the flattened weight layout built in _phase_weights.
        views = []
        for a in range(2):
            for b in range(2):
                for i in range(n_inputs):
                    views.append(fulls[i][a:a + th, b:b + w_out, :])
        lhs = jnp.concatenate(views, axis=-1)            # (TH, W, 4*Cin) bf16

        acc = lax.dot_general(
            lhs, w_ref[...],
            dimension_numbers=(((2,), (0,)), ((), ())),
            preferred_element_type=jnp.float32)          # (TH, W, P) f32
        o_ref[0] = (acc + b_ref[0]).astype(o_ref.dtype)  # bf16 writeback

    return kernel


def _phase_weights(w_t):
    """ConvTranspose2d weight (Cin, Cout, 3, 3) -> conv taps (4, Cin, 4*Cout).

    Tap index = a*2 + b over the 2x2 conv on the padded input; output channel
    p = (dy*2 + dx)*Cout + co is sub-pixel phase (dy, dx) of channel co.
    The ConvTranspose tap used by phase (dy, dx) at conv tap (a, b) is
    (ky, kx) = (dy + 1 - 2a, dx + 1 - 2b), zero if outside the 3x3 kernel.
    """
    cin, cout = w_t.shape[0], w_t.shape[1]
    taps = []
    for a in range(2):
        for b in range(2):
            cols = []
            for dy in range(2):
                for dx in range(2):
                    ky = dy + 1 - 2 * a
                    kx = dx + 1 - 2 * b
                    if 0 <= ky < KH and 0 <= kx < KW:
                        cols.append(w_t[:, :, ky, kx])            # (Cin, Cout)
                    else:
                        cols.append(jnp.zeros((cin, cout), w_t.dtype))
            taps.append(jnp.concatenate(cols, axis=1))            # (Cin, 4*Cout)
    return jnp.stack(taps, axis=0)                                # (4, Cin, 4*Cout)


def _pick_row_tile(h, w_pad, w, cin_total, p, budget_bytes=8 << 20):
    """Largest divisor of H whose per-step VMEM footprint fits the budget."""
    per_row = (4 * w_pad * cin_total      # bf16 main input blocks, double-buffered
               + 2 * w * 4 * cin_total    # bf16 stacked lhs (in-VMEM temp)
               + 4 * w * p                # f32 accumulator
               + 4 * w * p)               # bf16 output block, double-buffered
    th = max(1, min(h, budget_bytes // max(per_row, 1)))
    while h % th:
        th -= 1
    return th


def upsampling_block_forward(inputs, w_t, bias, row_tile=None):
    """Forward of UpSamplingBlock.  `inputs` is an NCHW array or a tuple/list
    of NCHW arrays (channel-concat fused into the kernel).  w_t: ConvTranspose2d
    weight (Cin, Cout, 3, 3); bias: (Cout,)."""
    if not isinstance(inputs, (tuple, list)):
        inputs = (inputs,)
    inputs = tuple(inputs)
    out_dtype = inputs[0].dtype

    N, _, H, W = inputs[0].shape
    cin_list = tuple(int(x.shape[1]) for x in inputs)
    cin_total = sum(cin_list)
    cout = int(w_t.shape[1])
    assert w_t.shape == (cin_total, cout, KH, KW), (w_t.shape, cin_total)
    P = 4 * cout

    # NCHW -> NHWC per input (cast to bf16 first to halve transpose bytes),
    # pad one zero row at the bottom and pad the width up to a multiple of 8
    # (>= W+1) so the shifted b=1 tap view has clean sublane packing.
    Wp = _round_up(W + 1, 8)
    xs = []
    for x in inputs:
        xh = jnp.transpose(x.astype(jnp.bfloat16), (0, 2, 3, 1))   # (N, H, W, c)
        xh = jnp.pad(xh, ((0, 0), (0, 1), (0, Wp - W), (0, 0)))    # (N, H+1, Wp, c)
        xs.append(xh)

    # (4, Cin, P) -> (4*Cin, P): K index = tap*Cin + channel (tap-major).
    w_flat = _phase_weights(w_t).reshape(4 * cin_total, P).astype(jnp.bfloat16)
    b_phase = jnp.tile(bias.astype(jnp.float32), 4).reshape(1, P)  # (1, P)

    # Row-tile height: divisor of H sized for VMEM (or user override).
    if row_tile is None:
        th = _pick_row_tile(H, Wp, W, cin_total, P)
    else:
        th = max(1, min(int(row_tile), H))
        while H % th:
            th -= 1
    T = H // th

    halo_map = _make_halo_map(th)
    in_specs = [pl.BlockSpec((1, th, Wp, c), _main_map) for c in cin_list]      # main rows
    in_specs += [pl.BlockSpec((1, 1, Wp, c), halo_map) for c in cin_list]       # 1-row halo
    in_specs += [
        pl.BlockSpec((4 * cin_total, P), lambda n, t: (0, 0)),                  # resident weight
        pl.BlockSpec((1, P), lambda n, t: (0, 0)),                              # resident bias
    ]

    pre = pl.pallas_call(
        _make_kernel(len(xs), W),
        out_shape=jax.ShapeDtypeStruct((N, H, W, P), jnp.bfloat16),
        grid_spec=pltpu.PrefetchScalarGridSpec(
            num_scalar_prefetch=0,
            grid=(N, T),
            in_specs=in_specs,
            out_specs=pl.BlockSpec((1, th, W, P), _main_map),
        ),
        compiler_params=pltpu.CompilerParams(
            dimension_semantics=("parallel", "parallel")),
    )(*xs, *xs, w_flat, b_phase)

    # Depth-to-space + NCHW on the bf16 intermediate (single transpose pass):
    # (N, H, W, dy, dx, Cout) -> (N, Cout, H, dy, W, dx) -> (N, Cout, 2H, 2W).
    out = pre.reshape(N, H, W, 2, 2, cout)
    out = jnp.transpose(out, (0, 5, 1, 3, 2, 4))
    return out.reshape(N, cout, 2 * H, 2 * W).astype(out_dtype)


def _reference_forward(inputs, w_t, bias):
    """Pure-JAX f32 reference (lax conv with lhs dilation) for correctness."""
    if isinstance(inputs, (tuple, list)):
        inputs = jnp.concatenate(inputs, axis=1)
    x_nhwc = jnp.transpose(inputs, (0, 2, 3, 1))
    w_conv = jnp.transpose(w_t[:, :, ::-1, ::-1], (2, 3, 0, 1))    # HWIO
    out = lax.conv_general_dilated(
        x_nhwc, w_conv,
        window_strides=(1, 1),
        padding=((KH - 1 - PAD, KH - 1 - PAD + OUT_PAD),
                 (KW - 1 - PAD, KW - 1 - PAD + OUT_PAD)),
        lhs_dilation=(STRIDE, STRIDE),
        dimension_numbers=("NHWC", "HWIO", "NHWC"))
    out = out + bias[None, None, None, :]
    return jnp.transpose(out, (0, 3, 1, 2))


if __name__ == "__main__":
    key = jax.random.PRNGKey(0)
    k_x1, k_x2, k_w, k_b = jax.random.split(key, 4)

    # UpSamplingBlock(inp_channels=16) with defaults:
    #   out_channels = 16 // 2**2 = 4, ConvTranspose2d(16, 4, k=3, s=2, p=1, op=1)
    inp_channels = 16
    out_channels = inp_channels // (STRIDE ** 2)
    N, H, W = 2, 8, 8

    # forward accepts a list -> channel concat; give two halves of 8 channels.
    x1 = jax.random.normal(k_x1, (N, inp_channels // 2, H, W), jnp.float32)
    x2 = jax.random.normal(k_x2, (N, inp_channels // 2, H, W), jnp.float32)

    # deterministic synthetic parameters (ConvTranspose2d weight: (Cin, Cout, kH, kW))
    w_t = jax.random.normal(k_w, (inp_channels, out_channels, KH, KW), jnp.float32) * 0.1
    bias = jax.random.normal(k_b, (out_channels,), jnp.float32) * 0.1

    ref = jax.block_until_ready(_reference_forward([x1, x2], w_t, bias))

    # 1) auto row-tile (whole image in one tile at this toy size)
    out = jax.block_until_ready(upsampling_block_forward([x1, x2], w_t, bias))
    assert out.shape == (N, out_channels, H * STRIDE, W * STRIDE), out.shape
    # bf16 operands + bf16 writeback with f32 accumulation -> loosened tolerance.
    assert jnp.allclose(out, ref, atol=2e-2, rtol=2e-2), float(jnp.max(jnp.abs(out - ref)))

    # 2) forced multi-tile run: exercises the H row-tiling + halo-row path.
    out_t = jax.block_until_ready(
        upsampling_block_forward([x1, x2], w_t, bias, row_tile=4))
    assert jnp.allclose(out_t, ref, atol=2e-2, rtol=2e-2), float(jnp.max(jnp.abs(out_t - ref)))

    print("KERNEL_OK")
</pallas_src>

<mosaic_0001>
module attributes {stable_mosaic.version = 11 : i64} {
  func.func @kernel(%arg0: i32, %arg1: i32, %arg2: memref<1x8x16x8xbf16, #tpu.memory_space<vmem>>, %arg3: memref<1x8x16x8xbf16, #tpu.memory_space<vmem>>, %arg4: memref<1x1x16x8xbf16, #tpu.memory_space<vmem>>, %arg5: memref<1x1x16x8xbf16, #tpu.memory_space<vmem>>, %arg6: memref<64x16xbf16, #tpu.memory_space<vmem>>, %arg7: memref<1x16xf32, #tpu.memory_space<vmem>>, %arg8: memref<1x8x8x16xbf16, #tpu.memory_space<vmem>>) attributes {dimension_semantics = [#tpu.dimension_semantics<parallel>, #tpu.dimension_semantics<parallel>], iteration_bounds = array<i64: 2, 1>, scalar_prefetch = 0 : i64, scratch_operands = 0 : i64, tpu.core_type = #tpu.core_type<tc>, window_params = [{transform_indices = @transform_0, window_bounds = array<i64: 1, 8, 16, 8>}, {transform_indices = @transform_1, window_bounds = array<i64: 1, 8, 16, 8>}, {transform_indices = @transform_2, window_bounds = array<i64: 1, 1, 16, 8>}, {transform_indices = @transform_3, window_bounds = array<i64: 1, 1, 16, 8>}, {pipeline_mode = #tpu.pipeline_mode<synchronous>, transform_indices = @transform_4, window_bounds = array<i64: 64, 16>}, {pipeline_mode = #tpu.pipeline_mode<synchronous>, transform_indices = @transform_5, window_bounds = array<i64: 1, 16>}, {transform_indices = @transform_6, window_bounds = array<i64: 1, 8, 8, 16>}]} {
    %c0 = arith.constant 0 : index
    %c0_0 = arith.constant 0 : index
    %c0_1 = arith.constant 0 : index
    %c0_2 = arith.constant 0 : index
    %0 = vector.load %arg2[%c0, %c0_0, %c0_1, %c0_2] : memref<1x8x16x8xbf16, #tpu.memory_space<vmem>>, vector<1x8x16x8xbf16>
    %1 = vector.shape_cast %0 : vector<1x8x16x8xbf16> to vector<8x16x8xbf16>
    %c0_3 = arith.constant 0 : index
    %c0_4 = arith.constant 0 : index
    %c0_5 = arith.constant 0 : index
    %c0_6 = arith.constant 0 : index
    %2 = vector.load %arg4[%c0_3, %c0_4, %c0_5, %c0_6] : memref<1x1x16x8xbf16, #tpu.memory_space<vmem>>, vector<1x1x16x8xbf16>
    %3 = vector.shape_cast %2 : vector<1x1x16x8xbf16> to vector<1x16x8xbf16>
    %4 = tpu.concatenate %1, %3 in 0 : vector<8x16x8xbf16>, vector<1x16x8xbf16> -> vector<9x16x8xbf16>
    %c0_7 = arith.constant 0 : index
    %c0_8 = arith.constant 0 : index
    %c0_9 = arith.constant 0 : index
    %c0_10 = arith.constant 0 : index
    %5 = vector.load %arg3[%c0_7, %c0_8, %c0_9, %c0_10] : memref<1x8x16x8xbf16, #tpu.memory_space<vmem>>, vector<1x8x16x8xbf16>
    %6 = vector.shape_cast %5 : vector<1x8x16x8xbf16> to vector<8x16x8xbf16>
    %c0_11 = arith.constant 0 : index
    %c0_12 = arith.constant 0 : index
    %c0_13 = arith.constant 0 : index
    %c0_14 = arith.constant 0 : index
    %7 = vector.load %arg5[%c0_11, %c0_12, %c0_13, %c0_14] : memref<1x1x16x8xbf16, #tpu.memory_space<vmem>>, vector<1x1x16x8xbf16>
    %8 = vector.shape_cast %7 : vector<1x1x16x8xbf16> to vector<1x16x8xbf16>
    %9 = tpu.concatenate %6, %8 in 0 : vector<8x16x8xbf16>, vector<1x16x8xbf16> -> vector<9x16x8xbf16>
    %10 = vector.extract_strided_slice %4 {offsets = [0, 0, 0], sizes = [8, 8, 8], strides = [1, 1, 1]} : vector<9x16x8xbf16> to vector<8x8x8xbf16>
    %11 = vector.extract_strided_slice %9 {offsets = [0, 0, 0], sizes = [8, 8, 8], strides = [1, 1, 1]} : vector<9x16x8xbf16> to vector<8x8x8xbf16>
    %12 = vector.extract_strided_slice %4 {offsets = [0, 1, 0], sizes = [8, 8, 8], strides = [1, 1, 1]} : vector<9x16x8xbf16> to vector<8x8x8xbf16>
    %13 = vector.extract_strided_slice %9 {offsets = [0, 1, 0], sizes = [8, 8, 8], strides = [1, 1, 1]} : vector<9x16x8xbf16> to vector<8x8x8xbf16>
    %14 = vector.extract_strided_slice %4 {offsets = [1, 0, 0], sizes = [8, 8, 8], strides = [1, 1, 1]} : vector<9x16x8xbf16> to vector<8x8x8xbf16>
    %15 = vector.extract_strided_slice %9 {offsets = [1, 0, 0], sizes = [8, 8, 8], strides = [1, 1, 1]} : vector<9x16x8xbf16> to vector<8x8x8xbf16>
    %16 = vector.extract_strided_slice %4 {offsets = [1, 1, 0], sizes = [8, 8, 8], strides = [1, 1, 1]} : vector<9x16x8xbf16> to vector<8x8x8xbf16>
    %17 = vector.extract_strided_slice %9 {offsets = [1, 1, 0], sizes = [8, 8, 8], strides = [1, 1, 1]} : vector<9x16x8xbf16> to vector<8x8x8xbf16>
    %18 = tpu.concatenate %10, %11, %12, %13, %14, %15, %16, %17 in 2 : vector<8x8x8xbf16>, vector<8x8x8xbf16>, vector<8x8x8xbf16>, vector<8x8x8xbf16>, vector<8x8x8xbf16>, vector<8x8x8xbf16>, vector<8x8x8xbf16>, vector<8x8x8xbf16> -> vector<8x8x64xbf16>
    %c0_15 = arith.constant 0 : index
    %c0_16 = arith.constant 0 : index
    %19 = vector.load %arg6[%c0_15, %c0_16] : memref<64x16xbf16, #tpu.memory_space<vmem>>, vector<64x16xbf16>
    %cst = arith.constant dense<0.000000e+00> : vector<8x8x16xf32>
    %20 = tpu.matmul %18, %19, %cst {dimension_numbers = #tpu.dot_dimension_numbers<[2], [0], [0, 1], [1], [0, 0, 0, 1, 1, 1], [], []>} : vector<8x8x64xbf16>, vector<64x16xbf16>, vector<8x8x16xf32> -> vector<8x8x16xf32>
    %c0_17 = arith.constant 0 : index
    %c0_18 = arith.constant 0 : index
    %21 = vector.load %arg7[%c0_17, %c0_18] : memref<1x16xf32, #tpu.memory_space<vmem>>, vector<1x16xf32>
    %22 = vector.shape_cast %21 : vector<1x16xf32> to vector<16xf32>
    %23 = vector.shape_cast %22 : vector<16xf32> to vector<1x1x16xf32>
    %24 = vector.broadcast %23 : vector<1x1x16xf32> to vector<8x8x16xf32>
    %25 = arith.addf %20, %24 : vector<8x8x16xf32>
    %26 = arith.truncf %25 : vector<8x8x16xf32> to vector<8x8x16xbf16>
    %c0_19 = arith.constant 0 : index
    %c0_20 = arith.constant 0 : index
    %c0_21 = arith.constant 0 : index
    %c0_22 = arith.constant 0 : index
    %27 = vector.load %arg8[%c0_19, %c0_20, %c0_21, %c0_22] : memref<1x8x8x16xbf16, #tpu.memory_space<vmem>>, vector<1x8x8x16xbf16>
    %28 = vector.shape_cast %27 : vector<1x8x8x16xbf16> to vector<8x8x16xbf16>
    %29 = vector.shape_cast %26 : vector<8x8x16xbf16> to vector<1x8x8x16xbf16>
    tpu.vector_store %arg8[%c0_19, %c0_20, %c0_21, %c0_22], %29 {strides = array<i32>} : memref<1x8x8x16xbf16, #tpu.memory_space<vmem>>, vector<1x8x8x16xbf16>,
    return
  }
  func.func @transform_0(%arg0: i32, %arg1: i32) -> (i32, i32, i32, i32) {
    %c0_i32 = arith.constant 0 : i32
    %c0_i32_0 = arith.constant 0 : i32
    %c0_i32_1 = arith.constant 0 : i32
    return %arg0, %arg1, %c0_i32, %c0_i32_0 : i32, i32, i32, i32
  }
  func.func @transform_1(%arg0: i32, %arg1: i32) -> (i32, i32, i32, i32) {
    %c0_i32 = arith.constant 0 : i32
    %c0_i32_0 = arith.constant 0 : i32
    %c0_i32_1 = arith.constant 0 : i32
    return %arg0, %arg1, %c0_i32, %c0_i32_0 : i32, i32, i32, i32
  }
  func.func @transform_2(%arg0: i32, %arg1: i32) -> (i32, i32, i32, i32) {
    %c1_i32 = arith.constant 1 : i32
    %0 = arith.addi %arg1, %c1_i32 : i32
    %c8_i32 = arith.constant 8 : i32
    %1 = arith.muli %0, %c8_i32 : i32
    %c0_i32 = arith.constant 0 : i32
    %c0_i32_0 = arith.constant 0 : i32
    %c0_i32_1 = arith.constant 0 : i32
    return %arg0, %1, %c0_i32, %c0_i32_0 : i32, i32, i32, i32
  }
  func.func @transform_3(%arg0: i32, %arg1: i32) -> (i32, i32, i32, i32) {
    %c1_i32 = arith.constant 1 : i32
    %0 = arith.addi %arg1, %c1_i32 : i32
    %c8_i32 = arith.constant 8 : i32
    %1 = arith.muli %0, %c8_i32 : i32
    %c0_i32 = arith.constant 0 : i32
    %c0_i32_0 = arith.constant 0 : i32
    %c0_i32_1 = arith.constant 0 : i32
    return %arg0, %1, %c0_i32, %c0_i32_0 : i32, i32, i32, i32
  }
  func.func @transform_4(%arg0: i32, %arg1: i32) -> (i32, i32) {
    %c0_i32 = arith.constant 0 : i32
    %c0_i32_0 = arith.constant 0 : i32
    %c0_i32_1 = arith.constant 0 : i32
    return %c0_i32, %c0_i32_0 : i32, i32
  }
  func.func @transform_5(%arg0: i32, %arg1: i32) -> (i32, i32) {
    %c0_i32 = arith.constant 0 : i32
    %c0_i32_0 = arith.constant 0 : i32
    %c0_i32_1 = arith.constant 0 : i32
    return %c0_i32, %c0_i32_0 : i32, i32
  }
  func.func @transform_6(%arg0: i32, %arg1: i32) -> (i32, i32, i32, i32) {
    %c0_i32 = arith.constant 0 : i32
    %c0_i32_0 = arith.constant 0 : i32
    %c0_i32_1 = arith.constant 0 : i32
    return %arg0, %arg1, %c0_i32, %c0_i32_0 : i32, i32, i32, i32
  }
}

</mosaic_0001>

<bundles_post_ra>
// kernel: tpu_custom_call.1
= control target key start
LH: loop header
LB: loop body
LE: loop exit
PB: predicated region body
PF: predicated region fallthrough
CT: control target
= control target key end

     0   :  { %11 = vsyncpa [#allocation3], 0  ;;  %s2096_s0 = inlined_call_operand.vmem [shape: bf16[2,9,16,8], index: 0, kind: input, shape index: {}]   ;;  %s2097_s1 = inlined_call_operand.vmem [shape: bf16[2,9,16,8], index: 1, kind: input, shape index: {}]   ;;  %s2098_s2 = inlined_call_operand.vmem [shape: bf16[2,9,16,8], index: 2, kind: input, shape index: {}]   ;;  %s2099_s3 = inlined_call_operand.vmem [shape: bf16[2,9,16,8], index: 3, kind: input, shape index: {}]   ;;  %s2100_s4 = inlined_call_operand.vmem [shape: bf16[64,16], index: 4, kind: input, shape index: {}]   ;;  %s2101_s5 = inlined_call_operand.vmem [shape: f32[1,16], index: 5, kind: input, shape index: {}]   ;;  %s2102_s6 = inlined_call_operand.hbm [shape: bf16[2,8,8,16], index: 6, kind: output, shape index: {}]  }
   0x1   :  { %13 = vsyncpa [#allocation3 + $0x1], 0  ;;  %s1624_s21 = smov 0   ;;  %s1626_s22 = smov 0  }
   0x2   :  { %s1628_s23 = smov 0   ;;  %s1630_s24 = smov 0  }
   0x3   :  { %s1632_s25 = smov 0   ;;  %s1634_s26 = smov 0  }
   0x4 LB: > { %s1293_s27 = sadd.s32 4294967295, %s1577_s26   ;;  %s1294_s28 = sadd.s32 4294967294, %s1577_s26   ;;  %s1577_s26 = sphi %s1634_s26, %s19_s26   ;;  %s1573_s25 = sphi %s1632_s25, %s2109_s25   ;;  %s1569_s24 = sphi %s1630_s24, %s2108_s24   ;;  %s1565_s23 = sphi %s1628_s23, %s2107_s23   ;;  %s1561_s22 = sphi %s1626_s22, %s2106_s22   ;;  %s1557_s21 = sphi %s1624_s21, %s2105_s21  }
   0x5   : > { %s31_s29 = sadd.s32 1, %s1573_s25  ;;  %s202_s30 = sadd.s32 1, %s1565_s23 }
   0x6   : > { %p33_p0 = scmp.ge.s32.totalorder %s31_s29, 2  ;;  %p212_p1 = scmp.ne.s32.totalorder %s1565_s23, %s1561_s22 }
   0x7   : > { %p213_p2 = scmp.eq.s32.totalorder %s1293_s27, 1  ;;  %p218_p3 = scmp.ne.s32.totalorder %s1561_s22, %s1557_s21 }
   0x8   : > { %s2111_s29 = smov (%p33_p0, %s31_s29), 0  ;;  %p219_p5 = scmp.eq.s32.totalorder %s1294_s28, 1 }
   0x9   : > { %p1664_p4 = por %p213_p2, %p212_p1  ;;  %s197_s8 = ssub.s32 %s1573_s25, %s2111_s29 }
   0xa   : > { %p1297_p6 = scmp.ge.s32.totalorder %s1577_s26, 1  ;;  %p200_p7 = scmp.eq.s32.totalorder %s197_s8, 0 }
   0xb   : > { %p1671_p8 = por %p219_p5, %p218_p3  ;;  %p323_p9 = scmp.lt.s32.totalorder %s1577_s26, 3 }
   0xc   : > { %s1677_s10 = scalar_select %p200_p7, %s1565_s23, %s202_s30  }
   0xd   : > { %p324_p10 = pnand %p1297_p6, %p323_p9 }
   0xe   : > { %p406_p11 = scmp.lt.s32.totalorder (!%p324_p10), %s1569_s24, 1  ;;  %s1579_s16 = smov (!%p324_p10), 8   ;;  %vm851_vm0 = vcmask (!%p324_p10), 64512   ;;  %vm876_vm1 = vcmask (!%p324_p10), 130048   ;;  %vm893_vm2 = vcmask (!%p324_p10), 195584   ;;  %vm910_vm3 = vcmask (!%p324_p10), 261120  }
   0xf   : > { %327 = sbr.rel (%p324_p10) target bundleno = 491 (0x1eb), region = 44  ;;  %s1580_s20 = smov (!%p324_p10), 16   ;;  %vm927_vm4 = vcmask (!%p324_p10), 326656   ;;  %vm944_vm5 = vcmask (!%p324_p10), 392192   ;;  %vm961_vm6 = vcmask (!%p324_p10), 457728   ;;  %vm1037_vm7 = vcmask (!%p324_p10), 523264  }
  0x10   : > { %s1581_s27 = smov (!%p324_p10), 24   ;;  %s1582_s30 = smov (!%p324_p10), 32   ;;  %vm1123_vm8 = vcmask (!%p324_p10), 125952  }
  0x11   : > { %s1360_s18 = sshll.u32 (!%p324_p10), %s1569_s24, 9  ;;  %s1586_s8 = smov (!%p324_p10), [#allocation2]  }
  0x16   : > { %s407_s11 = scalar_select %p406_p11, %s1569_s24, 1 }
  0x18   : > { %s1681_s12 = smul.u32 72, %s407_s11  ;;  %s1503_s11 = sshll.u32 %s1586_s8, 4  ;;  %s1504_s11 = int_to_ptr.vmem [resolvable:$false] %s1503_s11 }
  0x1a   : > { %s1687_s15 = scalar_lea.vmem %s2097_s1, %s1681_s12  ;;  %s1722_s19 = scalar_lea.vmem %s2096_s0, %s1681_s12 }
  0x1b   : > { %v1690_v0 = vld [vmem:[%s1687_s15 + $0x20] sm:$0xf]  ;;  %v1702_v4 = vld [vmem:[%s1687_s15 + $0x28] sm:$0xf]  ;;  %v1725_v8 = vld [vmem:[%s1687_s15 + $0x18] sm:$0xf] }
  0x1c   : > { %v1693_v1 = vld [vmem:[%s1687_s15] sm:$0xf]  ;;  %v1697_v2 = vcombine.low %v1690_v0, %v1690_v0  ;;  %v1705_v5 = vld [vmem:[%s1687_s15 + $0x8] sm:$0xf]  ;;  %v1712_v6 = vcombine.low %v1702_v4, %v1702_v4  ;;  %v1728_v9 = vld [vmem:[%s1687_s15 + $0x10] sm:$0xf]  ;;  %v1749_v15 = vcombine.low %v1725_v8, %v1725_v8 }
  0x1d   : > { %v1303_v3 = vcombine.low %v1693_v1, %v1693_v1  ;;  %v1716_v7 = vcombine.low %v1705_v5, %v1705_v5  ;;  %v1731_v10 = vld [vmem:[%s1687_s15 + $0x38] sm:$0xf]  ;;  %v1734_v11 = vld [vmem:[%s1687_s15 + $0x30] sm:$0xf]  ;;  %v1737_v12 = vld [vmem:[%s1722_s19 + $0x8] sm:$0xf]  ;;  %v1753_v16 = vcombine.low %v1728_v9, %v1728_v9 }
  0x1e   : > { %538 = vrot.lane.b32.xlu1 %v1697_v2, %s1579_s16  ;;  %v473_v13 = vld [vmem:[%s1722_s19 + $0xc] sm:$0xf]  ;;  %v1741_v14 = vld [vmem:[%s1722_s19] sm:$0xf]  ;;  %v471_v18 = vld [vmem:[%s1722_s19 + $0x4] sm:$0xf]  ;;  %v1774_v29 = vcombine.low %v1731_v10, %v1731_v10  ;;  %v1787_v35 = vcombine.low %v1734_v11, %v1734_v11 }
  0x1f   : > { %530 = vrot.lane.b32.xlu0 %v1303_v3, %s1579_s16  ;;  %v1312_v17 = vcombine.low %v1737_v12, %v473_v13  ;;  %v1758_v19 = vld [vmem:[%s1722_s19 + $0x28] sm:$0xf]  ;;  %v1311_v20 = vcombine.low %v1741_v14, %v471_v18  ;;  %v481_v21 = vld [vmem:[%s1722_s19 + $0x2c] sm:$0xf]  ;;  %v1763_v22 = vld [vmem:[%s1722_s19 + $0x20] sm:$0xf] }
  0x20   : > { %v479_v23 = vld [vmem:[%s1722_s19 + $0x24] sm:$0xf]  ;;  %v1316_v25 = vcombine.low %v1758_v19, %v481_v21  ;;  %v1769_v27 = vld [vmem:[%s1722_s19 + $0x18] sm:$0xf]  ;;  %v477_v28 = vld [vmem:[%s1722_s19 + $0x1c] sm:$0xf] }
  0x21   : > { %v596_v24 = vshll.u32 %v1312_v17, 16  ;;  %v1315_v26 = vcombine.low %v1763_v22, %v479_v23  ;;  %v594_v30 = vshrl.u32 %v1312_v17, 16  ;;  %v589_v31 = vshll.u32 %v1311_v20, 16  ;;  %v1778_v33 = vld [vmem:[%s1722_s19 + $0x10] sm:$0xf]  ;;  %s1357_s28 = sadd.s32 64, %s1681_s12 }
  0x22   : > { %540 = vrot.lane.b32.xlu1 %v1712_v6, %s1579_s16  ;;  %v1314_v32 = vcombine.low %v1769_v27, %v477_v28  ;;  %v475_v34 = vld [vmem:[%s1722_s19 + $0x14] sm:$0xf]  ;;  %v587_v37 = vshrl.u32 %v1311_v20, 16  ;;  %v624_v38 = vshll.u32 %v1316_v25, 16  ;;  %v1790_v39 = vld [vmem:[%s1722_s19 + $0x38] sm:$0xf]  ;;  %s452_s13 = scalar_lea.vmem %s2098_s2, %s1357_s28 }
  0x23   : > { %532 = vrot.lane.b32.xlu0 %v1716_v7, %s1579_s16  ;;  %v598_v36 = vrot.slane %v596_v24, 1  ;;  %v591_v40 = vrot.slane %v589_v31, 1  ;;  %v617_v41 = vshll.u32 %v1315_v26, 16  ;;  %v485_v42 = vld [vmem:[%s1722_s19 + $0x3c] sm:$0xf]  ;;  %v622_v43 = vshrl.u32 %v1316_v25, 16 }
  0x24   : > { %v615_v44 = vshrl.u32 %v1315_v26, 16  ;;  %v1313_v45 = vcombine.low %v1778_v33, %v475_v34  ;;  %v1795_v46 = vld [vmem:[%s1722_s19 + $0x30] sm:$0xf]  ;;  %v483_v47 = vld [vmem:[%s1722_s19 + $0x34] sm:$0xf]  ;;  %v626_v51 = vrot.slane %v624_v38, 1  ;;  %v1318_v53 = vcombine.low %v1790_v39, %v485_v42 }
  0x25   : > { %v489_v48 = vld [vmem:[%s1687_s15 + $0x4] sm:$0xf]  ;;  %v491_v49 = vld [vmem:[%s1687_s15 + $0xc] sm:$0xf]  ;;  %v1800_v50 = vor.u32 %v598_v36, %v594_v30  ;;  %v610_v52 = vshll.u32 %v1314_v32, 16  ;;  %v592_v54 = vor.u32 %v591_v40, %v587_v37  ;;  %v619_v55 = vrot.slane %v617_v41, 1 }
  0x26   : > { %536 = vrot.lane.b32.xlu1 %v1749_v15, %s1579_s16  ;;  %v603_v56 = vshll.u32 %v1313_v45, 16  ;;  %v1317_v57 = vcombine.low %v1795_v46, %v483_v47  ;;  %v497_v58 = vld [vmem:[%s1687_s15 + $0x24] sm:$0xf]  ;;  %v1319_v59 = vcombine.low %v1693_v1, %v489_v48  ;;  %v1320_v60 = vcombine.low %v1705_v5, %v491_v49  ;;  %v499_v61 = vld [vmem:[%s1687_s15 + $0x2c] sm:$0xf]  ;;  %s1583_s12 = smov 40  }
  0x27   : > { %534 = vrot.lane.b32.xlu0 %v1753_v16, %s1579_s16  ;;  %v1812_v62 = vor.u32 %v626_v51, %v622_v43  ;;  %v608_v63 = vshrl.u32 %v1314_v32, 16  ;;  %v612_v3 = vrot.slane %v610_v52, 1  ;;  %v601_v13 = vshrl.u32 %v1313_v45, 16  ;;  %v495_v24 = vld [vmem:[%s1687_s15 + $0x1c] sm:$0xf] }
  0x28   : > { %v1817_v17 = vor.u32 %v619_v55, %v615_v44  ;;  %v605_v18 = vrot.slane %v603_v56, 1  ;;  %v638_v1 = vshll.u32 %v1318_v53, 16  ;;  %v631_v20 = vshll.u32 %v1317_v57, 16  ;;  %v493_v30 = vld [vmem:[%s1687_s15 + $0x14] sm:$0xf] }
  0x29   : > { %v1323_v5 = vcombine.low %v1690_v0, %v497_v58  ;;  %v1324_v21 = vcombine.low %v1702_v4, %v499_v61  ;;  %v685_v23 = vshll.u32 %v1319_v59, 16  ;;  %v1822_v25 = vor.u32 %v612_v3, %v608_v63  ;;  %v503_v40 = vld [vmem:[%s1687_s15 + $0x3c] sm:$0xf]  ;;  %v501_v43 = vld [vmem:[%s1687_s15 + $0x34] sm:$0xf] }
  0x2a   : > { %544 = vrot.lane.b32.xlu1 %v1774_v29, %s1579_s16  ;;  %v636_v26 = vshrl.u32 %v1318_v53, 16  ;;  %v692_v28 = vshll.u32 %v1320_v60, 16  ;;  %v1829_v31 = vor.u32 %v605_v18, %v601_v13  ;;  %v640_v0 = vrot.slane %v638_v1, 1 }
  0x2b   : > { %542 = vrot.lane.b32.xlu0 %v1787_v35, %s1579_s16  ;;  %v629_v32 = vshrl.u32 %v1317_v57, 16  ;;  %v633_v4 = vrot.slane %v631_v20, 1  ;;  %v713_v34 = vshll.u32 %v1323_v5, 16  ;;  %v683_v36 = vshrl.u32 %v1319_v59, 16  ;;  %s1893_s16 = scalar_lea.vmem %s2099_s3, %s1357_s28  ;;  %s2041_s28 = scalar_lea.hbm %s2102_s6, %s1360_s18 }
  0x2c   : > { %v1322_v37 = vcombine.low %v1725_v8, %v495_v24  ;;  %v1321_v38 = vcombine.low %v1728_v9, %v493_v30  ;;  %v690_v41 = vshrl.u32 %v1320_v60, 16  ;;  %v720_v42 = vshll.u32 %v1324_v21, 16 }
  0x2d   : > { %v1839_v44 = vor.u32 %v640_v0, %v636_v26  ;;  %v1841_v45 = vor.u32 %v633_v4, %v629_v32  ;;  %v694_v47 = vrot.slane %v692_v28, 1  ;;  %v687_v48 = vrot.slane %v685_v23, 1 }
  0x2e   : > { %644 = vrot.lane.b32.xlu1 %v1800_v50, %s1580_s20  ;;  %v711_v49 = vshrl.u32 %v1323_v5, 16  ;;  %v1326_v8 = vcombine.low %v1731_v10, %v503_v40  ;;  %v1325_v9 = vcombine.low %v1734_v11, %v501_v43  ;;  %v718_v51 = vshrl.u32 %v1324_v21, 16 }
  0x2f   : > { %642 = vrot.lane.b32.xlu0 %v592_v54, %s1580_s20  ;;  %v722_v52 = vrot.slane %v720_v42, 1  ;;  %v715_v53 = vrot.slane %v713_v34, 1  ;;  %v1849_v54 = vor.u32 %v694_v47, %v690_v41  ;;  %v688_v55 = vor.u32 %v687_v48, %v683_v36  ;;  %v486_v34 = vld [vmem:[%s452_s13] sm:$0xf]  ;;  %v487_v41 = vld [vmem:[%s452_s13 + $0x4] sm:$0xf] }
  0x30   : > { %v706_v56 = vshll.u32 %v1322_v37, 16  ;;  %v699_v57 = vshll.u32 %v1321_v38, 16  ;;  %v704_v10 = vshrl.u32 %v1322_v37, 16  ;;  %v697_v11 = vshrl.u32 %v1321_v38, 16  ;;  %v504_v38 = vld [vmem:[%s1893_s16] sm:$0xf] }
  0x31   : > { %v1851_v58 = vor.u32 %v722_v52, %v718_v51  ;;  %v1853_v59 = vor.u32 %v715_v53, %v711_v49  ;;  %v734_v63 = vshll.u32 %v1326_v8, 16  ;;  %v727_v3 = vshll.u32 %v1325_v9, 16  ;;  %v505_v42 = vld [vmem:[%s1893_s16 + $0x4] sm:$0xf]  ;;  %s1585_s13 = smov 56  }
  0x32   : > { %652 = vrot.lane.b32.xlu1 %v1812_v62, %s1580_s20  ;;  %v708_v60 = vrot.slane %v706_v56, 1  ;;  %v701_v61 = vrot.slane %v699_v57, 1  ;;  %v732_v13 = vshrl.u32 %v1326_v8, 16  ;;  %v725_v18 = vshrl.u32 %v1325_v9, 16 }
  0x33   : > { %650 = vrot.lane.b32.xlu0 %v1817_v17, %s1580_s20  ;;  %v736_v5 = vrot.slane %v734_v63, 1  ;;  %v729_v21 = vrot.slane %v727_v3, 1  ;;  %v1328_v26 = vcombine.low %v1778_v33, %v1778_v33  ;;  %v1327_v28 = vcombine.low %v1737_v12, %v1737_v12 }
  0x34   : > { %v1858_v1 = vor.u32 %v708_v60, %v704_v10  ;;  %v1860_v20 = vor.u32 %v701_v61, %v697_v11  ;;  %v1332_v30 = vcombine.low %v1795_v46, %v1795_v46  ;;  %v1331_v0 = vcombine.low %v1758_v19, %v1758_v19 }
  0x35   : > { %v1864_v23 = vor.u32 %v736_v5, %v732_v13  ;;  %v1866_v24 = vor.u32 %v729_v21, %v725_v18  ;;  %v1330_v32 = vcombine.low %v1763_v22, %v1763_v22  ;;  %v1329_v4 = vcombine.low %v1769_v27, %v1769_v27 }
  0x36   : > { %648 = vrot.lane.b32.xlu1 %v1822_v25, %s1580_s20  ;;  %v1334_v36 = vcombine.low %v486_v34, %v486_v34  ;;  %v1333_v37 = vcombine.low %v1790_v39, %v1790_v39  ;;  %v1335_v40 = vcombine.low %v504_v38, %v504_v38 }
  0x37   : > { %646 = vrot.lane.b32.xlu0 %v1829_v31, %s1580_s20 }
  0x3a   : > { %656 = vrot.lane.b32.xlu1 %v1839_v44, %s1580_s20 }
  0x3b   : > { %654 = vrot.lane.b32.xlu0 %v1841_v45, %s1580_s20 }
  0x3e   : > { %740 = vrot.lane.b32.xlu1 %v1849_v54, %s1581_s27 }
  0x3f   : > { %738 = vrot.lane.b32.xlu0 %v688_v55, %s1581_s27 }
  0x42   : > { %748 = vrot.lane.b32.xlu1 %v1851_v58, %s1581_s27 }
  0x43   : > { %746 = vrot.lane.b32.xlu0 %v1853_v59, %s1581_s27 }
  0x46   : > { %744 = vrot.lane.b32.xlu1 %v1858_v1, %s1581_s27 }
  0x47   : > { %742 = vrot.lane.b32.xlu0 %v1860_v20, %s1581_s27 }
  0x4a   : > { %752 = vrot.lane.b32.xlu1 %v1864_v23, %s1581_s27 }
  0x4b   : > { %750 = vrot.lane.b32.xlu0 %v1866_v24, %s1581_s27  ;;  %s1584_s27 = smov 48  }
  0x4e   : > { %766 = vrot.lane.b32.xlu1 %v1328_v26, %s1582_s30 }
  0x4f   : > { %764 = vrot.lane.b32.xlu0 %v1327_v28, %s1582_s30 }
  0x52   : > { %774 = vrot.lane.b32.xlu1 %v1332_v30, %s1582_s30 }
  0x53   : > { %772 = vrot.lane.b32.xlu0 %v1331_v0, %s1582_s30 }
  0x56   : > { %770 = vrot.lane.b32.xlu1 %v1330_v32, %s1582_s30 }
  0x57   : > { %768 = vrot.lane.b32.xlu0 %v1329_v4, %s1582_s30 }
  0x5a   : > { %778 = vrot.lane.b32.xlu1 %v1334_v36, %s1582_s30 }
  0x5b   : > { %776 = vrot.lane.b32.xlu0 %v1333_v37, %s1582_s30 }
  0x5e   : > { %785 = vrot.lane.b32.xlu1 %v1753_v16, %s1583_s12  ;;  %v1336_v16 = vcombine.low %v486_v34, %v487_v41 }
  0x5f   : > { %783 = vrot.lane.b32.xlu0 %v1716_v7, %s1583_s12  ;;  %v1495_v7 = vld [vmem:[%s2100_s4] sm:$0xff]  }
  0x60   : > { %1369 = vmatprep.subr.bf16.mxu0 %v1495_v7  ;;  %1385 = vmatprep.subr.bf16.mxu1 %v1495_v7 }
  0x61   : > { %1370 = vmatpush3.bf16.msra.mxu0 %v1495_v7  ;;  %1389 = vmatpush3.bf16.msra.mxu1 %v1495_v7 }
  0x62   : > { %793 = vrot.lane.b32.xlu1 %v1787_v35, %s1583_s12 }
  0x63   : > { %791 = vrot.lane.b32.xlu0 %v1712_v6, %s1583_s12  ;;  %v805_v6 = vshll.u32 %v1336_v16, 16 }
  0x65   : > { %v807_v35 = vrot.slane %v805_v6, 1 }
  0x66   : > { %789 = vrot.lane.b32.xlu1 %v1697_v2, %s1583_s12  ;;  %v1496_v2 = vld [vmem:[%s2100_s4 + $0x8] sm:$0xff]  }
  0x67   : > { %787 = vrot.lane.b32.xlu0 %v1749_v15, %s1583_s12  ;;  %1371 = vmatprep.subr.bf16.mxu0 %v1496_v2  ;;  %v1497_v15 = vld [vmem:[%s2100_s4 + $0x10] sm:$0xff]  }
  0x68   : > { %1386 = vmatprep.subr.bf16.mxu1 %v1496_v2  ;;  %1372 = vmatpush3.bf16.msra.mxu0 %v1496_v2 }
  0x69   : > { %1390 = vmatpush3.bf16.msra.mxu1 %v1496_v2  ;;  %1373 = vmatprep.subr.bf16.mxu0 %v1497_v15 }
  0x6a   : > { %797 = vrot.lane.b32.xlu1 %v1335_v40, %s1583_s12  ;;  %1387 = vmatprep.subr.bf16.mxu1 %v1497_v15 }
  0x6b   : > { %795 = vrot.lane.b32.xlu0 %v1774_v29, %s1583_s12  ;;  %v803_v29 = vshrl.u32 %v1336_v16, 16  ;;  %s397_s12 = sand.u32 1, %s1561_s22  }
  0x6c   : > { %1374 = vmatpush3.bf16.msra.mxu0 %v1497_v15  ;;  %s1298_s16 = sshll.u32 %s397_s12, 5  ;;  %s2050_s24 = scalar_lea.sflag [#allocation3], %s397_s12 }
  0x6d   : > { %1391 = vmatpush3.bf16.msra.mxu1 %v1497_v15  ;;  %s399_s17 = scalar_lea.vmem [#allocation2], %s1298_s16 }
  0x6e   : > { %811 = vrot.lane.b32.xlu1 %v1829_v31, %s1584_s27  ;;  %v808_v31 = vor.u32 %v807_v35, %v803_v29  ;;  %s1148_s19 = sshll.u32 %s399_s17, 4  ;;  %s2043_s19 = int_to_ptr.vmem [resolvable:$true] %s1148_s19 }
  0x6f   : > { %809 = vrot.lane.b32.xlu0 %v1800_v50, %s1584_s27  ;;  %v1498_v50 = vld [vmem:[%s2100_s4 + $0x18] sm:$0xff]   ;;  %s1499_s30 = scalar_lea.vmem %s2043_s19, 512  ;;  %p1506_p1 = scmp.lt.s32.totalorder %s2043_s19, %s1504_s11 }
  0x70   : > { %1375 = vmatprep.subr.bf16.mxu0 %v1498_v50  ;;  %1388 = vmatprep.subr.bf16.mxu1 %v1498_v50  ;;  %p1500_p12 = scmp.ne.s32.totalorder %s2043_s19, %s1499_s30 }
  0x71   : > { %1376 = vmatpush3.bf16.msra.mxu0 %v1498_v50  ;;  %1392 = vmatpush3.bf16.msra.mxu1 %v1498_v50 }
  0x72   : > { %819 = vrot.lane.b32.xlu1 %v1841_v45, %s1584_s27  ;;  %p1501_p13 = pnand %p1500_p12, %p1664_p4 }
  0x73   : > { %817 = vrot.lane.b32.xlu0 %v1812_v62, %s1584_s27  ;;  %v1337_v62 = vcombine.low %v504_v38, %v505_v42 }
  0x74   : > { %p1502_p0 = pneg %p1501_p13 }
  0x75   : > { %v831_v43 = vshll.u32 %v1337_v62, 16 }
  0x76   : > { %815 = vrot.lane.b32.xlu1 %v1817_v17, %s1584_s27  ;;  %v829_v17 = vshrl.u32 %v1337_v62, 16 }
  0x77   : > { %813 = vrot.lane.b32.xlu0 %v1822_v25, %s1584_s27  ;;  %v833_v25 = vrot.slane %v831_v43, 1 }
  0x79   : > { %v834_v45 = vor.u32 %v833_v25, %v829_v17 }
  0x7a   : > { %823 = vrot.lane.b32.xlu1 %v808_v31, %s1584_s27 }
  0x7b   : > { %821 = vrot.lane.b32.xlu0 %v1839_v44, %s1584_s27 }
  0x7e   : > { %837 = vrot.lane.b32.xlu1 %v1860_v20, %s1585_s13 }
  0x7f   : > { %835 = vrot.lane.b32.xlu0 %v1849_v54, %s1585_s13 }
  0x82   : > { %845 = vrot.lane.b32.xlu1 %v1866_v24, %s1585_s13 }
  0x83   : > { %843 = vrot.lane.b32.xlu0 %v1851_v58, %s1585_s13 }
  0x86   : > { %841 = vrot.lane.b32.xlu1 %v1853_v59, %s1585_s13 }
  0x87   : > { %839 = vrot.lane.b32.xlu0 %v1858_v1, %s1585_s13 }
  0x8a   : > { %849 = vrot.lane.b32.xlu1 %v834_v45, %s1585_s13 }
  0x8b   : > { %847 = vrot.lane.b32.xlu0 %v1864_v23, %s1585_s13  ;;  %s1505_s13 = scalar_lea.vmem %s1504_s11, 1024 }
  0x8c   : > { %p1507_p2 = scmp.lt.s32.totalorder %s1505_s13, %s1499_s30 }
  0x8e   : > { %p1508_p3 = por %p1507_p2, %p1506_p1 }
  0x90   : > { %v539_v44 = vpop.permute.xlu1 %538  ;;  %p1509_p5 = pnand %p1508_p3, %p1502_p0 }
  0x91   : > { %v531_v47 = vpop.permute.xlu0 %530  ;;  %v866_v59 = vsel %vm851_vm0, %v1763_v22, %v539_v44 }
  0x92   : > { %v854_v53 = vsel %vm851_vm0, %v1741_v14, %v531_v47 }
  0x94   : > { %v541_v48 = vpop.permute.xlu1 %540 }
  0x95   : > { %v533_v49 = vpop.permute.xlu0 %532  ;;  %v869_v10 = vsel %vm851_vm0, %v1758_v19, %v541_v48 }
  0x96   : > { %v857_v54 = vsel %vm851_vm0, %v1737_v12, %v533_v49 }
  0x98   : > { %v537_v8 = vpop.permute.xlu1 %536 }
  0x99   : > { %v535_v9 = vpop.permute.xlu0 %534  ;;  %v863_v12 = vsel %vm851_vm0, %v1769_v27, %v537_v8 }
  0x9a   : > { %v860_v63 = vsel %vm851_vm0, %v1778_v33, %v535_v9 }
  0x9c   : > { %v545_v51 = vpop.permute.xlu1 %544 }
  0x9d   : > { %v543_v52 = vpop.permute.xlu0 %542  ;;  %v875_v18 = vsel %vm851_vm0, %v1790_v39, %v545_v51 }
  0x9e   : > { %v872_v1 = vsel %vm851_vm0, %v1795_v46, %v543_v52 }
  0xa0   : > { %v645_v55 = vpop.permute.xlu1 %644 }
  0xa1   : > { %v643_v56 = vpop.permute.xlu0 %642  ;;  %v880_v57 = vsel %vm876_vm1, %v857_v54, %v645_v55 }
  0xa2   : > { %v878_v58 = vsel %vm876_vm1, %v854_v53, %v643_v56 }
  0xa4   : > { %v653_v11 = vpop.permute.xlu1 %652 }
  0xa5   : > { %v651_v60 = vpop.permute.xlu0 %650  ;;  %v1939_v61 = vsel %vm876_vm1, %v869_v10, %v653_v11 }
  0xa6   : > { %v1942_v14 = vsel %vm876_vm1, %v866_v59, %v651_v60 }
  0xa8   : > { %v649_v3 = vpop.permute.xlu1 %648 }
  0xa9   : > { %v647_v13 = vpop.permute.xlu0 %646  ;;  %v1949_v22 = vsel %vm876_vm1, %v863_v12, %v649_v3 }
  0xaa   : > { %v1952_v19 = vsel %vm876_vm1, %v860_v63, %v647_v13 }
  0xac   : > { %v657_v20 = vpop.permute.xlu1 %656 }
  0xad   : > { %v655_v5 = vpop.permute.xlu0 %654  ;;  %v1959_v27 = vsel %vm876_vm1, %v875_v18, %v657_v20 }
  0xae   : > { %v1962_v33 = vsel %vm876_vm1, %v872_v1, %v655_v5 }
  0xb0   : > { %v741_v21 = vpop.permute.xlu1 %740 }
  0xb1   : > { %v739_v23 = vpop.permute.xlu0 %738  ;;  %v897_v44 = vsel %vm893_vm2, %v880_v57, %v741_v21 }
  0xb2   : > { %v895_v47 = vsel %vm893_vm2, %v878_v58, %v739_v23 }
  0xb4   : > { %v749_v24 = vpop.permute.xlu1 %748 }
  0xb5   : > { %v747_v26 = vpop.permute.xlu0 %746  ;;  %v905_v55 = vsel %vm893_vm2, %v1939_v61, %v749_v24 }
  0xb6   : > { %v903_v56 = vsel %vm893_vm2, %v1942_v14, %v747_v26 }
  0xb8   : > { %v745_v28 = vpop.permute.xlu1 %744 }
  0xb9   : > { %v743_v30 = vpop.permute.xlu0 %742  ;;  %v901_v13 = vsel %vm893_vm2, %v1949_v22, %v745_v28 }
  0xba   : > { %v899_v18 = vsel %vm893_vm2, %v1952_v19, %v743_v30 }
  0xbc   : > { %v1964_v0 = vpop.permute.xlu1 %752 }
  0xbd   : > { %v1966_v39 = vpop.permute.xlu0 %750  ;;  %v909_v30 = vsel %vm893_vm2, %v1959_v27, %v1964_v0 }
  0xc0   : > { %v767_v32 = vpop.permute.xlu1 %766 }
  0xc1   : > { %v765_v46 = vpop.permute.xlu0 %764  ;;  %v914_v48 = vsel %vm910_vm3, %v897_v44, %v767_v32 }
  0xc2   : > { %v912_v49 = vsel %vm910_vm3, %v895_v47, %v765_v46  ;;  %v907_v46 = vsel %vm893_vm2, %v1962_v33, %v1966_v39 }
  0xc4   : > { %v775_v4 = vpop.permute.xlu1 %774 }
  0xc5   : > { %v773_v34 = vpop.permute.xlu0 %772  ;;  %v922_v59 = vsel %vm910_vm3, %v905_v55, %v775_v4 }
  0xc6   : > { %v920_v10 = vsel %vm910_vm3, %v903_v56, %v773_v34 }
  0xc8   : > { %v771_v36 = vpop.permute.xlu1 %770 }
  0xc9   : > { %v769_v37 = vpop.permute.xlu0 %768  ;;  %v918_v5 = vsel %vm910_vm3, %v901_v13, %v771_v36 }
  0xca   : > { %v916_v21 = vsel %vm910_vm3, %v899_v18, %v769_v37 }
  0xcc   : > { %v1968_v38 = vpop.permute.xlu1 %778 }
  0xcd   : > { %v1970_v40 = vpop.permute.xlu0 %776  ;;  %v926_v36 = vsel %vm910_vm3, %v909_v30, %v1968_v38 }
  0xce   : > { %v924_v37 = vsel %vm910_vm3, %v907_v46, %v1970_v40  ;;  %v1338_v40 = vld [vmem:[%s2101_s5] ss:$0 sm:$0xff] }
  0xd0   : > { %v786_v41 = vpop.permute.xlu1 %785 }
  0xd1   : > { %v784_v7 = vpop.permute.xlu0 %783  ;;  %v931_v8 = vsel %vm927_vm4, %v914_v48, %v786_v41 }
  0xd2   : > { %v929_v9 = vsel %vm927_vm4, %v912_v49, %v784_v7 }
  0xd4   : > { %v794_v16 = vpop.permute.xlu1 %793 }
  0xd5   : > { %v792_v2 = vpop.permute.xlu0 %791  ;;  %v939_v60 = vsel %vm927_vm4, %v922_v59, %v794_v16 }
  0xd6   : > { %v937_v12 = vsel %vm927_vm4, %v920_v10, %v792_v2 }
  0xd8   : > { %v790_v6 = vpop.permute.xlu1 %789 }
  0xd9   : > { %v788_v15 = vpop.permute.xlu0 %787  ;;  %v935_v24 = vsel %vm927_vm4, %v918_v5, %v790_v6 }
  0xda   : > { %v933_v26 = vsel %vm927_vm4, %v916_v21, %v788_v15 }
  0xdc   : > { %v798_v29 = vpop.permute.xlu1 %797 }
  0xdd   : > { %v796_v35 = vpop.permute.xlu0 %795  ;;  %v943_v7 = vsel %vm927_vm4, %v926_v36, %v798_v29 }
  0xde   : > { %v941_v27 = vsel %vm927_vm4, %v924_v37, %v796_v35 }
  0xe0   : > { %v812_v50 = vpop.permute.xlu1 %811 }
  0xe1   : > { %v810_v31 = vpop.permute.xlu0 %809  ;;  %v948_v51 = vsel %vm944_vm5, %v931_v8, %v812_v50 }
  0xe2   : > { %v946_v52 = vsel %vm944_vm5, %v929_v9, %v810_v31 }
  0xe4   : > { %v820_v42 = vpop.permute.xlu1 %819 }
  0xe5   : > { %v818_v62 = vpop.permute.xlu0 %817  ;;  %v956_v63 = vsel %vm944_vm5, %v939_v60, %v820_v42 }
  0xe6   : > { %v954_v61 = vsel %vm944_vm5, %v937_v12, %v818_v62 }
  0xe8   : > { %v816_v43 = vpop.permute.xlu1 %815 }
  0xe9   : > { %v814_v17 = vpop.permute.xlu0 %813  ;;  %v952_v32 = vsel %vm944_vm5, %v935_v24, %v816_v43 }
  0xea   : > { %v950_v22 = vsel %vm944_vm5, %v933_v26, %v814_v17 }
  0xec   : > { %v824_v25 = vpop.permute.xlu1 %823 }
  0xed   : > { %v822_v45 = vpop.permute.xlu0 %821  ;;  %v960_v0 = vsel %vm944_vm5, %v943_v7, %v824_v25 }
  0xee   : > { %v958_v33 = vsel %vm944_vm5, %v941_v27, %v822_v45 }
  0xf0   : > { %v838_v53 = vpop.permute.xlu1 %837 }
  0xf1   : > { %v836_v54 = vpop.permute.xlu0 %835  ;;  %v965_v57 = vsel %vm961_vm6, %v948_v51, %v838_v53 }
  0xf2   : > { %v963_v58 = vsel %vm961_vm6, %v946_v52, %v836_v54 }
  0xf3   : > { %v1339_v11 = vcombine.low %v963_v58, %v965_v57 }
  0xf4   : > { %v846_v3 = vpop.permute.xlu1 %845 }
  0xf5   : > { %1377 = vmatprep.mubr.msk.bf16.mxu0 %vm1037_vm7, %v1339_v11  ;;  %v844_v14 = vpop.permute.xlu0 %843  ;;  %v973_v1 = vsel %vm961_vm6, %v956_v63, %v846_v3 }
  0xf6   : > { %v971_v20 = vsel %vm961_vm6, %v954_v61, %v844_v14 }
  0xf7   : > { %v1341_v23 = vcombine.low %v971_v20, %v973_v1 }
  0xf8   : > { %v842_v28 = vpop.permute.xlu1 %841 }
  0xf9   : > { %1381 = vmatprep.mubr.msk.bf16.mxu1 %vm1037_vm7, %v1341_v23  ;;  %v840_v19 = vpop.permute.xlu0 %839  ;;  %v969_v4 = vsel %vm961_vm6, %v952_v32, %v842_v28 }
  0xfa   : > { %v967_v34 = vsel %vm961_vm6, %v950_v22, %v840_v19 }
  0xfb   : > { %v1340_v41 = vcombine.low %v967_v34, %v969_v4 }
  0xfc   : > { %v850_v39 = vpop.permute.xlu1 %849 }
  0xfd   : > { %1378 = vmatmul.mubr.msk.bf16.vlgmr.msra.gmra.mrb[0].mxu0 %vm1037_vm7, %v1340_v41  ;;  %v848_v16 = vpop.permute.xlu0 %847  ;;  %v977_v2 = vsel %vm961_vm6, %v960_v0, %v850_v39 }
  0xfe   : > { %v975_v38 = vsel %vm961_vm6, %v958_v33, %v848_v16 }
  0xff   : > { %v1342_v6 = vcombine.low %v975_v38, %v977_v2 }
 0x101   : > { %1382 = vmatmul.mubr.msk.bf16.vlgmr.msra.gmra.mrb[0].mxu1 %vm1037_vm7, %v1342_v6 }
 0x1d0   : > { %v1379_v15 = vpop.f32.mrb[0].mxu0 }
 0x1d1   : > { %v1093_v29 = vadd.f32 %v1379_v15, %v1338_v40  ;;  %v1084_v35 = vpop.f32.mrb[1].mxu0 }
 0x1d2   : > { %v1085_v50 = vadd.f32 %v1338_v40, %v1084_v35  ;;  %v1380_v31 = vpop.f32.mrb[2].mxu0 }
 0x1d3   : > { %v1117_v42 = vpack.c.bf16 %v1093_v29, %v1093_v29  ;;  %v1096_v62 = vadd.f32 %v1380_v31, %v1338_v40  ;;  %v1087_v43 = vpop.f32.mrb[3].mxu0 }
 0x1d4   : > { %v1115_v17 = vpack.c.bf16 %v1085_v50, %v1085_v50  ;;  %v1088_v25 = vadd.f32 %v1338_v40, %v1087_v43  ;;  %v1383_v45 = vpop.f32.mrb[0].mxu1 }
 0x1d5   : > { %1126 = vst.msk [vmem:[%s399_s17 + $0x8] sm:$0xf] %vm1123_vm8, %v1117_v42  ;;  %v1118_v44 = vpack.c.bf16 %v1096_v62, %v1096_v62  ;;  %v1109_v47 = vadd.f32 %v1383_v45, %v1338_v40  ;;  %v1100_v48 = vpop.f32.mrb[1].mxu1 }
 0x1d6   : > { %1124 = vst.msk [vmem:[%s399_s17] sm:$0xf] %vm1123_vm8, %v1115_v17  ;;  %v1116_v49 = vpack.c.bf16 %v1088_v25, %v1088_v25  ;;  %v1101_v8 = vadd.f32 %v1338_v40, %v1100_v48  ;;  %v1384_v9 = vpop.f32.mrb[2].mxu1 }
 0x1d7   : > { %1127 = vst.msk [vmem:[%s399_s17 + $0xc] sm:$0xf] %vm1123_vm8, %v1118_v44  ;;  %v1121_v51 = vpack.c.bf16 %v1109_v47, %v1109_v47  ;;  %v1112_v52 = vadd.f32 %v1384_v9, %v1338_v40  ;;  %v1103_v53 = vpop.f32.mrb[3].mxu1 }
 0x1d8   : > { %1125 = vst.msk [vmem:[%s399_s17 + $0x4] sm:$0xf] %vm1123_vm8, %v1116_v49  ;;  %v1119_v54 = vpack.c.bf16 %v1101_v8, %v1101_v8  ;;  %v1104_v55 = vadd.f32 %v1338_v40, %v1103_v53 }
 0x1d9   : > { %1130 = vst.msk [vmem:[%s399_s17 + $0x18] sm:$0xf] %vm1123_vm8, %v1121_v51  ;;  %v1122_v56 = vpack.c.bf16 %v1112_v52, %v1112_v52 }
 0x1da   : > { %1128 = vst.msk [vmem:[%s399_s17 + $0x10] sm:$0xf] %vm1123_vm8, %v1119_v54  ;;  %v1120_v57 = vpack.c.bf16 %v1104_v55, %v1104_v55 }
 0x1db   : > { %1131 = vst.msk [vmem:[%s399_s17 + $0x1c] sm:$0xf] %vm1123_vm8, %v1122_v56 }
 0x1dc   : > { %1129 = vst.msk [vmem:[%s399_s17 + $0x14] sm:$0xf] %vm1123_vm8, %v1120_v57 }
 0x1dd   : > { %1512 = shalt.err (!%p1509_p5)
}
 0x1de   : > { %s1513_s12 = scalar_lea.hbm %s2041_s28, 512  ;;  %s1517_s16 = scalar_lea.hbm %s2102_s6, 1024 }
 0x1df   : > { %p1514_p6 = scmp.ne.s32.totalorder %s2041_s28, %s1513_s12  ;;  %p1518_p10 = scmp.lt.u32.totalorder %s2041_s28, %s2102_s6 }
 0x1e0   : > { %p1519_p11 = scmp.lt.u32.totalorder %s1517_s16, %s1513_s12  ;;  %p1521_p13 = scmp.lt.u32.totalorder %s1513_s12, %s2041_s28 }
 0x1e1   : > { %p1515_p7 = pnand %p1514_p6, %p1664_p4 }
 0x1e2   : > { %p1520_p12 = por %p1519_p11, %p1518_p10 }
 0x1e3   : > { %p1516_p9 = pneg %p1515_p7 }
 0x1e4   : > { %p1522_p0 = por %p1521_p13, %p1520_p12 }
 0x1e6   : > { %p1523_p1 = pnand %p1522_p0, %p1516_p9 }
 0x1e8   : > { %1526 = shalt.err (!%p1523_p1)
}
 0x1e9   : > { %s1587_s20 = smov 64   ;;  %s1588_s27 = smov 4  }
 0x1ea   : > { %1395 = dma.vmem_to_hbm [thread:$0]  (%p1664_p4), %s2043_s19, 512, %s2041_s28, %s2050_s24, %s1587_s20, %s1587_s20, %s1588_s27  }
 0x1eb PF: > { %p1402_p2 = scmp.ge.s32.totalorder %s1577_s26, 2  ;;  %s1163_s30 = sand.u32 1, %s1557_s21  }
 0x1ec   : > { %s1164_s8 = scalar_lea.sflag [#allocation3], %s1163_s30 }
 0x1ed   : > { %p1398_p3 = pnand %p1402_p2, %p1671_p8 }
 0x1ef   : > { %1552 = dma.done.wait (!%p1398_p3), %s1164_s8, 512  }
 0x1f0   : > { %1554 = vsyncadd (!%p1398_p3), %s1164_s8, 4294966784  ;;  %s19_s26 = sadd.s32 1, %s1577_s26   ;;  %s2105_s21 = smov %s1561_s22 }
 0x1f1   : > { %p16_p5 = scmp.ge.s32.totalorder %s19_s26, 4   ;;  %s2106_s22 = smov %s1565_s23 }
 0x1f2   : > { %s2107_s23 = smov %s1677_s10  ;;  %s2108_s24 = smov %s1573_s25 }
 0x1f3   : > { %s2109_s25 = smov %s2111_s29  ;;  %18 = sbr.rel (!%p16_p5) target bundleno = 4 (0x4), region = 88 }
 0x1fa   :  { %1169 = vsyncpa [#allocation3], 1 }
 0x1fb   :  { %1171 = vsyncpa [#allocation3 + $0x1], 1 }

</bundles_post_ra>
